<compile_context>
chip_gen: v7x
topology: tpu7x:2x2x1
jax: 0.10.0
libtpu: 0.0.40
codegen_flags: <defaults>
</compile_context>

<pallas_src>
import functools

import jax
import jax.numpy as jnp
from jax.experimental import pallas as pl
from jax.experimental.pallas import tpu as pltpu

ALPHA = 1.0
GAMMA = 2.0


def _focal_kernel(logits_ref, tgt_ref, out_ref, *, alpha, gamma, hw, tile_hw,
                  last_j, needs_mask):
    j = pl.program_id(1)

    x = logits_ref[...].astype(jnp.float32)           # (bn, C, T)  lanes = spatial
    t = tgt_ref[...]                                   # (bn, 1, T)  int32 class ids

    # Numerically stable log-softmax pieces; class-axis reduces are tiny (C rows).
    m = jnp.max(x, axis=1, keepdims=True)              # (bn, 1, T)
    xm = x - m                                          # shifted logits, reused below
    e = jnp.exp(xm)                                     # single EUP exp pass over (bn, C, T)
    sumexp = jnp.sum(e, axis=1, keepdims=True)          # (bn, 1, T)

    # Gather target-class shifted logit (no f32 one-hot matmul).  Gathering on (x - m)
    # folds the "+ m - x_t" term of CE away (one fewer per-element VALU op).
    classes = jax.lax.broadcasted_iota(jnp.int32, x.shape, 1)
    tgt_shift = jnp.sum(jnp.where(classes == t, xm, 0.0), axis=1, keepdims=True)

    # ce = logsumexp(x) - x_t ; clamp >= 0 so pt <= 1 under fp rounding.
    ce = jnp.maximum(jnp.log(sumexp) - tgt_shift, 0.0)   # (bn, 1, T)
    pt = jnp.exp(-ce)
    one_minus_pt = 1.0 - pt
    if gamma == 2.0:
        w = jnp.square(one_minus_pt)                     # VPU mul, not EUP pow
    else:
        w = one_minus_pt ** gamma                        # safe: one_minus_pt >= 0
    focal = w * ce
    if alpha != 1.0:
        focal = alpha * focal                            # (bn, 1, T)

    if needs_mask:
        # Only the last spatial tile overlaps the Pallas-padded region; full tiles skip
        # the iota/compare/select entirely.  Masking happens BEFORE any reduction, so
        # padded-region garbage (possibly inf/NaN) never reaches the sum.
        @pl.when(j == last_j)
        def _():
            cols = j * tile_hw + jax.lax.broadcasted_iota(jnp.int32, focal.shape, 2)
            out_ref[...] = jnp.where(cols < hw, focal, 0.0)

        @pl.when(j != last_j)
        def _():
            out_ref[...] = focal
    else:
        out_ref[...] = focal


def _pick_budgets():
    """Return (block_bytes, vmem_limit_bytes) tuned per TPU generation.

    Footprint per grid step ~= 5-6x the logits block (double-buffered IO + f32
    temporaries), so the scoped-VMEM limit is raised explicitly: v5e's default
    is only 16 MiB.  v7x (64 MiB physical VMEM, 3.2 TB/s HBM) needs ~8 MiB
    blocks to keep the ~0.35us/step overhead <10%; v5e/v6e amortize at 4 MiB.
    """
    vmem_cap = 128 << 20
    try:
        vmem_cap = int(pltpu.get_tpu_info().vmem_capacity_bytes)
    except Exception:
        pass
    if vmem_cap <= (64 << 20):          # v7x-class core (small VMEM, very fast HBM)
        return 8 << 20, 48 << 20
    return 4 << 20, 40 << 20            # v5e / v6e (128 MiB VMEM)


def focal_loss_simple(logits_nchw, targets_nhw, *, alpha=ALPHA, gamma=GAMMA):
    """logits_nchw: (N, C, H, W) float; targets_nhw: (N, H, W) int. Returns scalar mean focal loss."""
    N, C, H, W = logits_nchw.shape
    HW = H * W
    R = N * HW

    # Pure views — no HBM copies.
    logits = logits_nchw.reshape(N, C, HW)
    targets = targets_nhw.reshape(N, 1, HW).astype(jnp.int32)

    block_bytes, vmem_limit = _pick_budgets()

    # Tiling: budget in f32 bytes (in-kernel temporaries are 32-bit even for bf16 inputs).
    itemsize = 4
    hw_ceil = ((HW + 127) // 128) * 128
    per_image = C * hw_ceil * itemsize
    if per_image <= block_bytes:
        # Small feature maps: pack several batch images per grid step so each step still
        # moves ~block_bytes instead of tiny, per-step-overhead-dominated tiles.
        tile_hw = hw_ceil
        bn = max(1, min(N, block_bytes // per_image))
        num_tiles = 1
    else:
        bn = 1
        tile_hw = min(hw_ceil, max(128, (block_bytes // (C * itemsize)) // 128 * 128))
        num_tiles = pl.cdiv(HW, tile_hw)
    needs_mask = (HW % tile_hw) != 0

    kernel = functools.partial(
        _focal_kernel,
        alpha=float(alpha), gamma=float(gamma),
        hw=HW, tile_hw=tile_hw, last_j=num_tiles - 1, needs_mask=needs_mask,
    )

    # Per-(n, j) focal partials, lane-dense (tile_hw-wide) writes; independent blocks, so
    # both grid axes are "parallel" (v7x megacore even for N == 1).  Host reduces.
    partial = pl.pallas_call(
        kernel,
        out_shape=jax.ShapeDtypeStruct((N, 1, num_tiles * tile_hw), jnp.float32),
        grid_spec=pltpu.PrefetchScalarGridSpec(
            num_scalar_prefetch=0,
            grid=(pl.cdiv(N, bn), num_tiles),
            in_specs=[
                pl.BlockSpec((bn, C, tile_hw), lambda i, j: (i, 0, j)),
                pl.BlockSpec((bn, 1, tile_hw), lambda i, j: (i, 0, j)),
            ],
            out_specs=pl.BlockSpec((bn, 1, tile_hw), lambda i, j: (i, 0, j)),
        ),
        compiler_params=pltpu.CompilerParams(
            dimension_semantics=("parallel", "parallel"),
            vmem_limit_bytes=vmem_limit,
        ),
    )(logits, targets)

    return jnp.sum(partial) / jnp.float32(R)


def _reference(logits_nchw, targets_nhw, alpha=ALPHA, gamma=GAMMA):
    # Pure-JAX reference matching torch CrossEntropyLoss(reduction='none') + focal + mean.
    N, C, H, W = logits_nchw.shape
    x = jnp.transpose(logits_nchw, (0, 2, 3, 1)).reshape(-1, C).astype(jnp.float32)
    t = targets_nhw.reshape(-1)
    logp = jax.nn.log_softmax(x, axis=-1)
    ce = -jnp.take_along_axis(logp, t[:, None], axis=-1)[:, 0]
    pt = jnp.exp(-ce)
    return jnp.mean(alpha * (1.0 - pt) ** gamma * ce)


if __name__ == "__main__":
    key = jax.random.PRNGKey(0)
    k1, k2 = jax.random.split(key)

    N, C, H, W = 2, 4, 16, 16
    logits = jax.random.normal(k1, (N, C, H, W), dtype=jnp.float32)
    targets = jax.random.randint(k2, (N, H, W), 0, C, dtype=jnp.int32)

    loss = jax.block_until_ready(focal_loss_simple(logits, targets))

    ref = _reference(logits, targets)
    assert jnp.allclose(loss, ref, rtol=1e-5, atol=1e-6), (loss, ref)

    print("KERNEL_OK")
</pallas_src>

<mosaic_0001>
module attributes {stable_mosaic.version = 11 : i64} {
  func.func @_focal_kernel(%arg0: i32, %arg1: i32, %arg2: memref<2x4x256xf32, #tpu.memory_space<vmem>>, %arg3: memref<2x1x256xi32, #tpu.memory_space<vmem>>, %arg4: memref<2x1x256xf32, #tpu.memory_space<vmem>>) attributes {dimension_semantics = [#tpu.dimension_semantics<parallel>, #tpu.dimension_semantics<parallel>], iteration_bounds = array<i64: 1, 1>, scalar_prefetch = 0 : i64, scratch_operands = 0 : i64, tpu.core_type = #tpu.core_type<tc>, window_params = [{transform_indices = @transform_0, window_bounds = array<i64: 2, 4, 256>}, {transform_indices = @transform_1, window_bounds = array<i64: 2, 1, 256>}, {transform_indices = @transform_2, window_bounds = array<i64: 2, 1, 256>}]} {
    %c0 = arith.constant 0 : index
    %c0_0 = arith.constant 0 : index
    %c0_1 = arith.constant 0 : index
    %0 = vector.load %arg2[%c0, %c0_0, %c0_1] : memref<2x4x256xf32, #tpu.memory_space<vmem>>, vector<2x4x256xf32>
    %c0_2 = arith.constant 0 : index
    %c0_3 = arith.constant 0 : index
    %c0_4 = arith.constant 0 : index
    %1 = vector.load %arg3[%c0_2, %c0_3, %c0_4] : memref<2x1x256xi32, #tpu.memory_space<vmem>>, vector<2x1x256xi32>
    %cst = arith.constant dense<0xFF800000> : vector<2x256xf32>
    %2 = vector.multi_reduction <maximumf>, %0, %cst [1] : vector<2x4x256xf32> to vector<2x256xf32>
    %3 = vector.shape_cast %2 : vector<2x256xf32> to vector<2x1x256xf32>
    %4 = vector.broadcast %3 : vector<2x1x256xf32> to vector<2x4x256xf32>
    %5 = arith.subf %0, %4 : vector<2x4x256xf32>
    %6 = math.exp %5 : vector<2x4x256xf32>
    %cst_5 = arith.constant dense<0.000000e+00> : vector<2x256xf32>
    %7 = vector.multi_reduction <add>, %6, %cst_5 [1] : vector<2x4x256xf32> to vector<2x256xf32>
    %8 = vector.shape_cast %7 : vector<2x256xf32> to vector<2x1x256xf32>
    %9 = tpu.iota {dimensions = array<i32: 1>} : vector<2x4x256xi32>
    %10 = vector.broadcast %1 : vector<2x1x256xi32> to vector<2x4x256xi32>
    %11 = arith.cmpi eq, %9, %10 : vector<2x4x256xi32>
    %cst_6 = arith.constant 0.000000e+00 : f32
    %12 = vector.broadcast %cst_6 : f32 to vector<2x4x256xf32>
    %13 = arith.select %11, %5, %12 : vector<2x4x256xi1>, vector<2x4x256xf32>
    %cst_7 = arith.constant dense<0.000000e+00> : vector<2x256xf32>
    %14 = vector.multi_reduction <add>, %13, %cst_7 [1] : vector<2x4x256xf32> to vector<2x256xf32>
    %15 = vector.shape_cast %14 : vector<2x256xf32> to vector<2x1x256xf32>
    %16 = math.log %8 : vector<2x1x256xf32>
    %17 = arith.subf %16, %15 : vector<2x1x256xf32>
    %cst_8 = arith.constant 0.000000e+00 : f32
    %18 = vector.broadcast %cst_8 : f32 to vector<2x1x256xf32>
    %19 = arith.maximumf %17, %18 : vector<2x1x256xf32>
    %cst_9 = arith.constant 0.000000e+00 : f32
    %20 = vector.broadcast %cst_9 : f32 to vector<2x1x256xf32>
    %21 = arith.subf %20, %19 : vector<2x1x256xf32>
    %22 = math.exp %21 : vector<2x1x256xf32>
    %cst_10 = arith.constant 1.000000e+00 : f32
    %23 = vector.broadcast %cst_10 : f32 to vector<2x1x256xf32>
    %24 = arith.subf %23, %22 : vector<2x1x256xf32>
    %25 = arith.mulf %24, %24 : vector<2x1x256xf32>
    %26 = arith.mulf %25, %19 : vector<2x1x256xf32>
    %c0_11 = arith.constant 0 : index
    %c0_12 = arith.constant 0 : index
    %c0_13 = arith.constant 0 : index
    %27 = vector.load %arg4[%c0_11, %c0_12, %c0_13] : memref<2x1x256xf32, #tpu.memory_space<vmem>>, vector<2x1x256xf32>
    tpu.vector_store %arg4[%c0_11, %c0_12, %c0_13], %26 {strides = array<i32>} : memref<2x1x256xf32, #tpu.memory_space<vmem>>, vector<2x1x256xf32>,
    return
  }
  func.func @transform_0(%arg0: i32, %arg1: i32) -> (i32, i32, i32) {
    %c0_i32 = arith.constant 0 : i32
    %c0_i32_0 = arith.constant 0 : i32
    return %arg0, %c0_i32, %arg1 : i32, i32, i32
  }
  func.func @transform_1(%arg0: i32, %arg1: i32) -> (i32, i32, i32) {
    %c0_i32 = arith.constant 0 : i32
    %c0_i32_0 = arith.constant 0 : i32
    return %arg0, %c0_i32, %arg1 : i32, i32, i32
  }
  func.func @transform_2(%arg0: i32, %arg1: i32) -> (i32, i32, i32) {
    %c0_i32 = arith.constant 0 : i32
    %c0_i32_0 = arith.constant 0 : i32
    return %arg0, %c0_i32, %arg1 : i32, i32, i32
  }
}

</mosaic_0001>

<bundles_post_ra>
// kernel: tpu_custom_call.1
= control target key start
LH: loop header
LB: loop body
LE: loop exit
PB: predicated region body
PF: predicated region fallthrough
CT: control target
= control target key end

     0   :  { %7 = vsyncpa [#allocation3], 0  ;;  %s477_s0 = inlined_call_operand.hbm [shape: f32[2,4,256], index: 0, kind: input, shape index: {}]   ;;  %s478_s1 = inlined_call_operand.hbm [shape: s32[2,1,256], index: 1, kind: input, shape index: {}]   ;;  %s479_s2 = inlined_call_operand.hbm [shape: f32[2,1,256], index: 2, kind: output, shape index: {}]  }
   0x1   :  { %8 = vsyncpa [#allocation6], 0 }
   0x2   :  { %9 = vsyncpa [#allocation4], 0  ;;  %s389_s9 = smov [#allocation2]   ;;  %s317_s13 = scalar_lea.hbm %s477_s0, 256 }
   0x3   :  { %s15_s10 = sshll.u32 %s389_s9, 4  ;;  %p318_p0 = scmp.ne.s32.totalorder %s477_s0, %s317_s13  ;;  %s16_s10 = int_to_ptr.vmem [resolvable:$true] %s15_s10 }
   0x4   :  { %p321_p1 = scmp.lt.u32.totalorder %s317_s13, %s477_s0 }
   0x6   :  { %p323_p2 = pnand %p321_p1, %p318_p0 }
   0x8   :  { %326 = shalt.err (!%p323_p2)
}
   0x9   :  { %s327_s18 = scalar_lea.vmem %s16_s10, 256  ;;  %p332_p4 = scmp.lt.s32.totalorder %s16_s10, %s16_s10 }
   0xa   :  { %p328_p3 = scmp.ne.s32.totalorder %s16_s10, %s327_s18  ;;  %p333_p5 = scmp.lt.s32.totalorder %s327_s18, %s327_s18 }
   0xc   :  { %p334_p6 = por %p333_p5, %p332_p4 }
   0xe   :  { %p335_p7 = pnand %p334_p6, %p328_p3 }
  0x10   :  { %338 = shalt.err (!%p335_p7)
}
  0x11   :  { %s390_s19 = smov 128   ;;  %s391_s20 = smov 8  }
  0x12   :  { %21 = dma.hbm_to_vmem [thread:$0]  %s477_s0, 256, %s16_s10, [#allocation3], %s390_s19, %s390_s19, %s391_s20  }
  0x13   :  { %s392_s23 = smov [#allocation5]   ;;  %s339_s27 = scalar_lea.hbm %s478_s1, 64 }
  0x14   :  { %s27_s24 = sshll.u32 %s392_s23, 4  ;;  %p340_p8 = scmp.ne.s32.totalorder %s478_s1, %s339_s27  ;;  %s28_s24 = int_to_ptr.vmem [resolvable:$true] %s27_s24 }
  0x15   :  { %p343_p9 = scmp.lt.u32.totalorder %s339_s27, %s478_s1 }
  0x17   :  { %p345_p10 = pnand %p343_p9, %p340_p8 }
  0x19   :  { %348 = shalt.err (!%p345_p10)
}
  0x1a   :  { %s349_s4 = scalar_lea.vmem %s28_s24, 64  ;;  %p354_p12 = scmp.lt.s32.totalorder %s28_s24, %s28_s24 }
  0x1b   :  { %p350_p11 = scmp.ne.s32.totalorder %s28_s24, %s349_s4  ;;  %p355_p13 = scmp.lt.s32.totalorder %s349_s4, %s349_s4 }
  0x1d   :  { %p356_p0 = por %p355_p13, %p354_p12 }
  0x1f   :  { %p357_p1 = pnand %p356_p0, %p350_p11 }
  0x21   :  { %360 = shalt.err (!%p357_p1)
}
  0x22   :  { %s393_s0 = smov 32   ;;  %s394_s5 = smov 2  }
  0x23   :  { %33 = dma.hbm_to_vmem [thread:$0]  %s478_s1, 64, %s28_s24, [#allocation6], %s393_s0, %s393_s0, %s394_s5  }
  0x24   :  { %383 = dma.done.wait [#allocation3], 256  }
  0x25   :  { %384 = vsyncadd [#allocation3], 4294967040 }
  0x26   :  { %385 = dma.done.wait [#allocation6], 64  }
  0x27   :  { %386 = vsyncadd [#allocation6], 4294967232  ;;  %vm50_vm0 = vcmask 1043456   ;;  %v40_v0 = vld [vmem:[#allocation2] sm:$0xff]  ;;  %v41_v1 = vld [vmem:[#allocation2 + $0x8] sm:$0xff]  ;;  %v127_v24 = vlaneseq  ;;  %s396_s1 = smov [#allocation7]  }
  0x28   :  { %v46_v2 = vcombine.high %v40_v0, %v40_v0  ;;  %v51_v3 = vsel %vm50_vm0, %v40_v0, -inf  ;;  %v47_v5 = vcombine.high %v41_v1, %v41_v1  ;;  %v65_v6 = vsel %vm50_vm0, %v41_v1, -inf  ;;  %v42_v38 = vld [vmem:[#allocation5] sm:$0x3]  ;;  %v43_v42 = vld [vmem:[#allocation5 + $0x2] sm:$0x3] }
  0x29   :  { %v52_v4 = vrot.slane %v51_v3, 4  ;;  %v66_v8 = vrot.slane %v65_v6, 4  ;;  %v444_v32 = vshrl.u32 %v127_v24, 7  ;;  %s274_s8 = sshll.u32 %s396_s1, 4  ;;  %vm265_vm5 = vcmp.lt.s32.totalorder %v127_v24, 256  ;;  %s275_s8 = int_to_ptr.vmem [resolvable:$true] %s274_s8 }
  0x2a   :  { %v58_v7 = vsel %vm50_vm0, %v46_v2, -inf  ;;  %v72_v11 = vsel %vm50_vm0, %v47_v5, -inf  ;;  %s361_s9 = scalar_lea.vmem %s275_s8, 64  ;;  %p366_p3 = scmp.lt.s32.totalorder %s275_s8, %s275_s8 }
  0x2b   :  { %v53_v9 = vmax.f32 %v51_v3, %v52_v4  ;;  %v59_v10 = vrot.slane %v58_v7, 4  ;;  %v67_v12 = vmax.f32 %v65_v6, %v66_v8  ;;  %v73_v13 = vrot.slane %v72_v11, 4  ;;  %p362_p2 = scmp.ne.s32.totalorder %s275_s8, %s361_s9  ;;  %p367_p4 = scmp.lt.s32.totalorder %s361_s9, %s361_s9 }
  0x2c   :  { %v131_v37 = vsub.s32 0, %v444_v32  ;;  %v135_v41 = vsub.s32 1, %v444_v32 }
  0x2d   :  { %v54_v14 = vrot.slane %v53_v9, 2  ;;  %v60_v15 = vmax.f32 %v58_v7, %v59_v10  ;;  %v68_v16 = vrot.slane %v67_v12, 2  ;;  %v74_v17 = vmax.f32 %v72_v11, %v73_v13  ;;  %p368_p5 = por %p367_p4, %p366_p3 }
  0x2e   :  { %v132_v44 = vrot.slane %v42_v38, %v131_v37  ;;  %v140_v45 = vrot.slane %v43_v42, %v131_v37  ;;  %v136_v46 = vrot.slane %v42_v38, %v135_v41  ;;  %v144_v47 = vrot.slane %v43_v42, %v135_v41 }
  0x2f   :  { %v55_v18 = vmax.f32 %v53_v9, %v54_v14  ;;  %v61_v19 = vrot.slane %v60_v15, 2  ;;  %v69_v20 = vmax.f32 %v67_v12, %v68_v16  ;;  %v75_v21 = vrot.slane %v74_v17, 2  ;;  %p369_p6 = pnand %p368_p5, %p362_p2 }
  0x30   :  { %vm145_vm1 = vcmp.eq.s32.totalorder %v444_v32, %v132_v44  ;;  %vm147_vm2 = vcmp.eq.s32.totalorder %v444_v32, %v140_v45  ;;  %vm146_vm3 = vcmp.eq.s32.totalorder %v444_v32, %v136_v46  ;;  %vm148_vm4 = vcmp.eq.s32.totalorder %v444_v32, %v144_v47 }
  0x31   :  { %v56_v22 = vrot.slane %v55_v18, 1  ;;  %v62_v23 = vmax.f32 %v60_v15, %v61_v19  ;;  %v70_v25 = vrot.slane %v69_v20, 1  ;;  %v76_v26 = vmax.f32 %v74_v17, %v75_v21 }
  0x33   :  { %v57_v27 = vmax.f32 %v55_v18, %v56_v22  ;;  %v63_v28 = vrot.slane %v62_v23, 1  ;;  %v71_v29 = vmax.f32 %v69_v20, %v70_v25  ;;  %v77_v30 = vrot.slane %v76_v26, 1 }
  0x35   :  { %v64_v31 = vmax.f32 %v62_v23, %v63_v28  ;;  %v78_v33 = vmax.f32 %v76_v26, %v77_v30 }
  0x37   :  { %v83_v34 = vcombine.low %v57_v27, %v64_v31  ;;  %v84_v35 = vcombine.low %v71_v29, %v78_v33 }
  0x39   :  { %v87_v36 = vsub.f32 %v40_v0, %v83_v34  ;;  %v88_v39 = vsub.f32 %v41_v1, %v84_v35 }
  0x3b   :  { %v89_v40 = vmul.f32 1.442695, %v87_v36  ;;  %v91_v43 = vmul.f32 1.442695, %v88_v39  ;;  %v151_v48 = vcombine.high %v87_v36, %v87_v36  ;;  %v152_v49 = vcombine.high %v88_v39, %v88_v39 }
  0x3c   :  { %v155_v50 = vsel %vm145_vm1, %v87_v36, 0.0  ;;  %v157_v51 = vsel %vm147_vm2, %v88_v39, 0.0 }
  0x3d   :  { %297 = vpow2.f32 %v89_v40  ;;  %v156_v52 = vsel %vm146_vm3, %v151_v48, 0.0  ;;  %v159_v54 = vsel %vm50_vm0, %v155_v50, 0.0  ;;  %v158_v55 = vsel %vm148_vm4, %v152_v49, 0.0 }
  0x3e   :  { %299 = vpow2.f32 %v91_v43  ;;  %v173_v59 = vsel %vm50_vm0, %v157_v51, 0.0  ;;  %v166_v61 = vsel %vm50_vm0, %v156_v52, 0.0  ;;  %v160_v1 = vrot.slane %v159_v54, 4 }
  0x3f   :  { %v180_v3 = vsel %vm50_vm0, %v158_v55, 0.0  ;;  %v174_v7 = vrot.slane %v173_v59, 4  ;;  %v167_v8 = vrot.slane %v166_v61, 4 }
  0x40   :  { %v181_v13 = vrot.slane %v180_v3, 4  ;;  %v161_v14 = vadd.f32 %v160_v1, %v159_v54 }
  0x41   :  { %v175_v19 = vadd.f32 %v174_v7, %v173_v59  ;;  %v168_v20 = vadd.f32 %v167_v8, %v166_v61 }
  0x42   :  { %v182_v26 = vadd.f32 %v181_v13, %v180_v3  ;;  %v162_v27 = vrot.slane %v161_v14, 2 }
  0x43   :  { %v176_v33 = vrot.slane %v175_v19, 2  ;;  %v169_v34 = vrot.slane %v168_v20, 2 }
  0x44   :  { %v183_v38 = vrot.slane %v182_v26, 2  ;;  %v163_v39 = vadd.f32 %v162_v27, %v161_v14 }
  0x45   :  { %v177_v41 = vadd.f32 %v176_v33, %v175_v19  ;;  %v170_v42 = vadd.f32 %v169_v34, %v168_v20 }
  0x46   :  { %v184_v43 = vadd.f32 %v183_v38, %v182_v26  ;;  %v164_v44 = vrot.slane %v163_v39, 1 }
  0x47   :  { %v298_v53 = vpop.eup %297  ;;  %v178_v45 = vrot.slane %v177_v41, 1  ;;  %v171_v46 = vrot.slane %v170_v42, 1 }
  0x48   :  { %v300_v56 = vpop.eup %299  ;;  %v95_v57 = vcombine.high %v298_v53, %v298_v53  ;;  %v99_v58 = vsel %vm50_vm0, %v298_v53, 0.0  ;;  %v185_v47 = vrot.slane %v184_v43, 1  ;;  %v165_v48 = vadd.f32 %v164_v44, %v163_v39 }
  0x49   :  { %v100_v60 = vrot.slane %v99_v58, 4  ;;  %v96_v62 = vcombine.high %v300_v56, %v300_v56  ;;  %v113_v63 = vsel %vm50_vm0, %v300_v56, 0.0  ;;  %v179_v50 = vadd.f32 %v178_v45, %v177_v41 }
  0x4a   :  { %v106_v0 = vsel %vm50_vm0, %v95_v57, 0.0  ;;  %v114_v2 = vrot.slane %v113_v63, 4  ;;  %v172_v52 = vadd.f32 %v171_v46, %v170_v42  ;;  %v186_v55 = vadd.f32 %v185_v47, %v184_v43 }
  0x4b   :  { %v101_v4 = vadd.f32 %v100_v60, %v99_v58  ;;  %v107_v5 = vrot.slane %v106_v0, 4  ;;  %v120_v6 = vsel %vm50_vm0, %v96_v62, 0.0 }
  0x4c   :  { %v115_v9 = vadd.f32 %v114_v2, %v113_v63  ;;  %v121_v10 = vrot.slane %v120_v6, 4 }
  0x4d   :  { %v102_v11 = vrot.slane %v101_v4, 2  ;;  %v108_v12 = vadd.f32 %v107_v5, %v106_v0 }
  0x4e   :  { %v116_v15 = vrot.slane %v115_v9, 2  ;;  %v122_v16 = vadd.f32 %v121_v10, %v120_v6 }
  0x4f   :  { %v103_v17 = vadd.f32 %v102_v11, %v101_v4  ;;  %v109_v18 = vrot.slane %v108_v12, 2 }
  0x50   :  { %v117_v21 = vadd.f32 %v116_v15, %v115_v9  ;;  %v123_v22 = vrot.slane %v122_v16, 2 }
  0x51   :  { %v104_v23 = vrot.slane %v103_v17, 1  ;;  %v110_v25 = vadd.f32 %v109_v18, %v108_v12  ;;  %v395_v12 = vmov 1966171168  }
  0x52   :  { %v118_v28 = vrot.slane %v117_v21, 1  ;;  %v124_v29 = vadd.f32 %v123_v22, %v122_v16  ;;  %v233_v13 = vunpack.c.l.s4 %v395_v12 }
  0x53   :  { %v105_v30 = vadd.f32 %v104_v23, %v103_v17  ;;  %v111_v31 = vrot.slane %v110_v25, 1 }
  0x54   :  { %v119_v35 = vadd.f32 %v118_v28, %v117_v21  ;;  %v125_v36 = vrot.slane %v124_v29, 1  ;;  %v234_v22 = vunpack.c.0.s8 %v233_v13 }
  0x55   :  { %v112_v37 = vadd.f32 %v111_v31, %v110_v25  ;;  %301 = vlog2.f32 %v105_v30 }
  0x56   :  { %v126_v40 = vadd.f32 %v125_v36, %v124_v29  ;;  %303 = vlog2.f32 %v119_v35  ;;  %v237_v31 = vsub.s32 %v234_v22, %v444_v32 }
  0x57   :  { %305 = vlog2.f32 %v112_v37 }
  0x58   :  { %307 = vlog2.f32 %v126_v40 }
  0x5f   :  { %v302_v49 = vpop.eup %301 }
  0x60   :  { %v304_v51 = vpop.eup %303  ;;  %v188_v53 = vmul.f32 0.6931472, %v302_v49 }
  0x61   :  { %v306_v54 = vpop.eup %305  ;;  %v192_v56 = vmul.f32 0.6931472, %v304_v51 }
  0x62   :  { %v308_v57 = vpop.eup %307  ;;  %v190_v58 = vmul.f32 0.6931472, %v306_v54  ;;  %v195_v59 = vsub.f32 %v188_v53, %v165_v48 }
  0x63   :  { %v194_v60 = vmul.f32 0.6931472, %v308_v57  ;;  %v197_v61 = vsub.f32 %v192_v56, %v179_v50 }
  0x64   :  { %v196_v62 = vsub.f32 %v190_v58, %v172_v52  ;;  %v199_v63 = vmax.f32 %v195_v59, 0.0 }
  0x65   :  { %v198_v0 = vsub.f32 %v194_v60, %v186_v55  ;;  %v201_v1 = vmax.f32 %v197_v61, 0.0 }
  0x66   :  { %v200_v2 = vmax.f32 %v196_v62, 0.0  ;;  %v203_v3 = vsub.f32 0.0, %v199_v63 }
  0x67   :  { %v202_v4 = vmax.f32 %v198_v0, 0.0  ;;  %v205_v5 = vsub.f32 0.0, %v201_v1 }
  0x68   :  { %v204_v6 = vsub.f32 0.0, %v200_v2  ;;  %v207_v7 = vmul.f32 1.442695, %v203_v3 }
  0x69   :  { %v206_v8 = vsub.f32 0.0, %v202_v4  ;;  %v211_v9 = vmul.f32 1.442695, %v205_v5 }
  0x6a   :  { %309 = vpow2.f32 %v207_v7  ;;  %v209_v10 = vmul.f32 1.442695, %v204_v6 }
  0x6b   :  { %311 = vpow2.f32 %v211_v9  ;;  %v213_v11 = vmul.f32 1.442695, %v206_v8 }
  0x6c   :  { %313 = vpow2.f32 %v209_v10 }
  0x6d   :  { %315 = vpow2.f32 %v213_v11 }
  0x74   :  { %v310_v14 = vpop.eup %309 }
  0x75   :  { %v312_v15 = vpop.eup %311  ;;  %v215_v16 = vsub.f32 1.0, %v310_v14 }
  0x76   :  { %v314_v17 = vpop.eup %313  ;;  %v217_v18 = vsub.f32 1.0, %v312_v15 }
  0x77   :  { %v316_v19 = vpop.eup %315  ;;  %v216_v20 = vsub.f32 1.0, %v314_v17  ;;  %v219_v21 = vmul.f32 %v215_v16, %v215_v16 }
  0x78   :  { %v218_v23 = vsub.f32 1.0, %v316_v19  ;;  %v221_v25 = vmul.f32 %v217_v18, %v217_v18 }
  0x79   :  { %v220_v26 = vmul.f32 %v216_v20, %v216_v20  ;;  %v223_v27 = vmul.f32 %v219_v21, %v199_v63 }
  0x7a   :  { %v222_v28 = vmul.f32 %v218_v23, %v218_v23  ;;  %v225_v29 = vmul.f32 %v221_v25, %v201_v1 }
  0x7b   :  { %v224_v30 = vmul.f32 %v220_v26, %v200_v2 }
  0x7c   :  { %v226_v33 = vmul.f32 %v222_v28, %v202_v4 }
  0x7d   :  { %v231_v34 = vcombine.low %v223_v27, %v224_v30 }
  0x7e   :  { %v246_v35 = vcombine.low %v225_v29, %v226_v33 }
  0x7f   :  { %v238_v36 = vrot.slane %v231_v34, %v237_v31 }
  0x80   :  { %v253_v37 = vrot.slane %v246_v35, %v237_v31 }
  0x81   :  { %v245_v38 = vrot.slane %v238_v36, %v237_v31 }
  0x82   :  { %v260_v39 = vrot.slane %v253_v37, %v237_v31 }
  0x83   :  { %267 = vst.msk [vmem:[#allocation7] sm:$0x3] %vm265_vm5, %v245_v38 }
  0x84   :  { %268 = vst.msk [vmem:[#allocation7 + $0x2] sm:$0x3] %vm265_vm5, %v260_v39 }
  0x85   :  { %372 = shalt.err (!%p369_p6)
}
  0x86   :  { %s373_s12 = scalar_lea.hbm %s479_s2, 64 }
  0x87   :  { %p374_p7 = scmp.ne.s32.totalorder %s479_s2, %s373_s12  ;;  %p377_p8 = scmp.lt.u32.totalorder %s373_s12, %s479_s2 }
  0x89   :  { %p379_p9 = pnand %p377_p8, %p374_p7 }
  0x8b   :  { %382 = shalt.err (!%p379_p9)
}
  0x8c   :  { %280 = dma.vmem_to_hbm [thread:$0]  %s275_s8, 64, %s479_s2, [#allocation4], %s393_s0, %s393_s0, %s394_s5  }
  0x8d   :  { %387 = dma.done.wait [#allocation4], 64  }
  0x8e   :  { %388 = vsyncadd [#allocation4], 4294967232 }
  0x8f   :  { %284 = vsyncpa [#allocation3], 1 }
  0x90   :  { %285 = vsyncpa [#allocation6], 1 }
  0x91   :  { %286 = vsyncpa [#allocation4], 1 }

</bundles_post_ra>
